<compile_context>
chip_gen: v7x
topology: tpu7x:2x2x1
jax: 0.10.0
libtpu: 0.0.40
codegen_flags: <defaults>
</compile_context>

<pallas_src>
import jax
import jax.numpy as jnp
from jax.experimental import pallas as pl
from jax.experimental.pallas import tpu as pltpu

_LANE = 128
_SUBLANE = 8
_MAX_ROW_TILE = 4096      # folded-row tile; f32 x 128 lanes -> 2 MiB / tile
_SMALL_M_ELEMS = 32768    # below this, a plain XLA dot beats any pallas_call


def _round_up(n, m):
    return ((n + m - 1) // m) * m


def _pick_lane_width():
    """256-lane fold on v6e/v7x (2x256x256 MXU), 128 on v5e / unknown."""
    try:
        kind = jax.devices()[0].device_kind.lower()
    except Exception:
        return _LANE
    if any(tag in kind for tag in ("v6", "v7", "tpu7", "7x")):
        return 2 * _LANE
    return _LANE


def _linear_kernel(x_ref, w_ref, o_ref):
    # y = x_tile @ W_block   (MXU matmul, f32 accumulate)
    o_ref[...] = jnp.dot(
        x_ref[...], w_ref[...], preferred_element_type=jnp.float32
    ).astype(o_ref.dtype)


def _dynamics_back_matmul(x_folded, w_block, tm, real_flops):
    """x_folded: (m_f, k), w_block: (k, k); grid streams row tiles of size tm."""
    mf, k = x_folded.shape
    grid = pl.cdiv(mf, tm)
    itemsize = x_folded.dtype.itemsize

    # VMEM budget: 2 pipeline buffers each for the x tile and the out tile,
    # plus the resident weight (double-buffered slot), plus headroom.
    tile_bytes = tm * k * itemsize
    w_bytes = k * k * w_block.dtype.itemsize
    vmem_limit = int(2 * (tile_bytes + tile_bytes) + 2 * w_bytes + (4 << 20))

    cost = pl.CostEstimate(
        flops=real_flops,                      # real work, not block-diag padded
        transcendentals=0,
        bytes_accessed=(2 * mf * k) * itemsize + w_bytes,
    )

    return pl.pallas_call(
        _linear_kernel,
        out_shape=jax.ShapeDtypeStruct((mf, k), x_folded.dtype),
        grid_spec=pltpu.PrefetchScalarGridSpec(
            num_scalar_prefetch=0,
            grid=(grid,),
            in_specs=[
                pl.BlockSpec((tm, k), lambda i: (i, 0)),   # row tiles stream
                pl.BlockSpec((k, k), lambda i: (0, 0)),    # weight stays resident
            ],
            out_specs=pl.BlockSpec((tm, k), lambda i: (i, 0)),
        ),
        compiler_params=pltpu.CompilerParams(
            dimension_semantics=("parallel",),  # megacore sharding on v7x
            vmem_limit_bytes=vmem_limit,
        ),
        cost_estimate=cost,
    )(x_folded, w_block)


def dynamics_back_forward(x, wt, w_block, b, fold, *,
                          force_pallas=False, stream_dtype=None):
    """y = x @ W^T with W^T pre-packed block-diagonally (fold copies) in w_block."""
    orig_shape = x.shape
    assert orig_shape[-1] == b
    x2 = x.reshape(-1, b)
    m = x2.shape[0]

    # Small-M fast path: fixed pallas_call launch + grid-step overhead dwarfs
    # the tiny matmul; a plain XLA dot fuses with its neighbours instead.
    if not force_pallas and m * b <= _SMALL_M_ELEMS:
        return (x2 @ wt).reshape(orig_shape)

    k = fold * b
    # Pad ONLY to a multiple of `fold` so the (m, b) -> (m_f, k) reshape is a
    # free bitcast.  No padding up to the row tile: Pallas handles the partial
    # last block, and its garbage rows are sliced off below.
    m_pad = _round_up(m, fold)
    if m_pad != m:
        x2 = jnp.pad(x2, ((0, m_pad - m), (0, 0)))
    m_f = m_pad // fold
    x_folded = x2.reshape(m_f, k)

    # Row tile: big enough to amortize ~0.35us/grid-step, capped so the grid
    # has >= 2 steps for large M (both v7x TensorCores participate).
    if m_f <= _SUBLANE:
        tm = m_f                                 # single full-array block
    else:
        tm = min(_MAX_ROW_TILE, _round_up(pl.cdiv(m_f, 2), _SUBLANE))

    if stream_dtype is not None:
        # Opt-in reduced-precision streaming for this HBM-bandwidth-bound
        # kernel; MXU still accumulates in f32 via preferred_element_type.
        x_folded = x_folded.astype(stream_dtype)
        w_block = w_block.astype(stream_dtype)

    y_folded = _dynamics_back_matmul(
        x_folded, w_block, tm, real_flops=2 * m * b * b)

    y = y_folded.reshape(m_pad, b)[:m].astype(x.dtype)
    return y.reshape(orig_shape)


class DynamicsBack:
    """JAX analogue of the PyTorch dynamics_back module."""

    def __init__(self, b, omega_weight, lane_width=None, stream_dtype=None):
        # torch: self.dynamics.weight = pinverse(omega.dynamics.weight.t())
        # nn.Linear forward: y = x @ W^T
        self.b = b
        self.weight = jnp.linalg.pinv(omega_weight.T)  # (out, in) layout
        assert self.weight.shape == (b, b)
        self.wt = self.weight.T                        # (in, out), built ONCE
        self.stream_dtype = stream_dtype

        # Lane-dense repack: fold `lanes // b` consecutive rows into the lane
        # axis and matmul against a block-diagonal kron(I_fold, W^T).
        lanes = _pick_lane_width() if lane_width is None else lane_width
        if b < lanes and lanes % b == 0:
            self.fold = lanes // b
        elif b < _LANE and _LANE % b == 0:
            self.fold = _LANE // b
        else:
            # TODO(synk): generalize the lane-dense fold when b does not divide
            # 128 (pad W^T's output dim); fold=1 is correct but lane-sparse.
            self.fold = 1
        self.w_block = jnp.kron(jnp.eye(self.fold, dtype=self.wt.dtype), self.wt)

    def __call__(self, x, force_pallas=False):
        return dynamics_back_forward(
            x, self.wt, self.w_block, self.b, self.fold,
            force_pallas=force_pallas, stream_dtype=self.stream_dtype)


if __name__ == "__main__":
    key = jax.random.PRNGKey(0)
    b = 32  # latent (Koopman) dimension

    k_omega, k_x1, k_x2 = jax.random.split(key, 3)
    # Deterministic synthetic "omega.dynamics.weight" (forward Koopman operator).
    omega_weight = jax.random.normal(k_omega, (b, b), dtype=jnp.float32) * 0.1

    model = DynamicsBack(b, omega_weight)
    wt_ref = model.weight.T  # reference nn.Linear(bias=False): y = x @ W^T

    # 1) Tiny production-like shape -> automatic XLA fast path.
    x_small = jax.random.normal(k_x1, (8, b), dtype=jnp.float32)
    y_small = jax.block_until_ready(model(x_small))
    assert y_small.shape == (8, b)
    assert jnp.allclose(y_small, x_small @ wt_ref, atol=2e-5, rtol=2e-5)

    # 2) Same tiny shape, forced through the Pallas kernel (partial-block path).
    y_small_p = jax.block_until_ready(model(x_small, force_pallas=True))
    assert jnp.allclose(y_small_p, x_small @ wt_ref, atol=2e-5, rtol=2e-5)

    # 3) 3-D batch large enough to take the Pallas path naturally
    #    (1200 rows -> >=2 row tiles, partial last block, no wrapper padding).
    x_big = jax.random.normal(k_x2, (4, 300, b), dtype=jnp.float32)
    y_big = jax.block_until_ready(model(x_big))
    assert y_big.shape == x_big.shape
    assert jnp.allclose(y_big, x_big @ wt_ref, atol=2e-5, rtol=2e-5)

    print("KERNEL_OK")
</pallas_src>

<mosaic_0001>
module attributes {stable_mosaic.version = 11 : i64} {
  func.func @_linear_kernel(%arg0: i32, %arg1: memref<2x128xf32, #tpu.memory_space<vmem>>, %arg2: memref<128x128xf32, #tpu.memory_space<vmem>>, %arg3: memref<2x128xf32, #tpu.memory_space<vmem>>) attributes {dimension_semantics = [#tpu.dimension_semantics<parallel>], iteration_bounds = array<i64: 1>, scalar_prefetch = 0 : i64, scratch_operands = 0 : i64, tpu.core_type = #tpu.core_type<tc>, window_params = [{transform_indices = @transform_0, window_bounds = array<i64: 2, 128>}, {pipeline_mode = #tpu.pipeline_mode<synchronous>, transform_indices = @transform_1, window_bounds = array<i64: 128, 128>}, {transform_indices = @transform_2, window_bounds = array<i64: 2, 128>}]} {
    %c0 = arith.constant 0 : index
    %c0_0 = arith.constant 0 : index
    %0 = vector.load %arg1[%c0, %c0_0] : memref<2x128xf32, #tpu.memory_space<vmem>>, vector<2x128xf32>
    %c0_1 = arith.constant 0 : index
    %c0_2 = arith.constant 0 : index
    %1 = vector.load %arg2[%c0_1, %c0_2] : memref<128x128xf32, #tpu.memory_space<vmem>>, vector<128x128xf32>
    %cst = arith.constant dense<0.000000e+00> : vector<2x128xf32>
    %2 = tpu.matmul %0, %1, %cst {dimension_numbers = #tpu.dot_dimension_numbers<[1], [0], [0], [1], [0, 0, 1, 1], [], []>} : vector<2x128xf32>, vector<128x128xf32>, vector<2x128xf32> -> vector<2x128xf32>
    %c0_3 = arith.constant 0 : index
    %c0_4 = arith.constant 0 : index
    %3 = vector.load %arg3[%c0_3, %c0_4] : memref<2x128xf32, #tpu.memory_space<vmem>>, vector<2x128xf32>
    tpu.vector_store %arg3[%c0_3, %c0_4], %2 {strides = array<i32>} : memref<2x128xf32, #tpu.memory_space<vmem>>, vector<2x128xf32>,
    return
  }
  func.func @transform_0(%arg0: i32) -> (i32, i32) {
    %c0_i32 = arith.constant 0 : i32
    %c0_i32_0 = arith.constant 0 : i32
    return %arg0, %c0_i32 : i32, i32
  }
  func.func @transform_1(%arg0: i32) -> (i32, i32) {
    %c0_i32 = arith.constant 0 : i32
    %c0_i32_0 = arith.constant 0 : i32
    %c0_i32_1 = arith.constant 0 : i32
    return %c0_i32, %c0_i32_0 : i32, i32
  }
  func.func @transform_2(%arg0: i32) -> (i32, i32) {
    %c0_i32 = arith.constant 0 : i32
    %c0_i32_0 = arith.constant 0 : i32
    return %arg0, %c0_i32 : i32, i32
  }
}

</mosaic_0001>

<bundles_post_ra>
// kernel: tpu_custom_call.1
= control target key start
LH: loop header
LB: loop body
LE: loop exit
PB: predicated region body
PF: predicated region fallthrough
CT: control target
= control target key end

     0   :  { %7 = vsyncpa [#allocation3], 0  ;;  %s364_s0 = inlined_call_operand.hbm [shape: f32[2,128], index: 0, kind: input, shape index: {}]   ;;  %s365_s1 = inlined_call_operand.hbm [shape: f32[128,128], index: 1, kind: input, shape index: {}]   ;;  %s366_s2 = inlined_call_operand.hbm [shape: f32[2,128], index: 2, kind: output, shape index: {}]  }
   0x1   :  { %8 = vsyncpa [#allocation6], 0 }
   0x2   :  { %9 = vsyncpa [#allocation4], 0  ;;  %s298_s9 = smov [#allocation2]   ;;  %s299_s11 = smov [#allocation5]  }
   0x3   :  { %s16_s10 = sshll.u32 %s298_s9, 4  ;;  %s25_s12 = sshll.u32 %s299_s11, 4  ;;  %s17_s10 = int_to_ptr.vmem [resolvable:$true] %s16_s10  ;;  %s321_s12 = int_to_ptr.vmem [resolvable:$true] %s25_s12 }
   0x4   :  { %s226_s15 = scalar_lea.hbm %s364_s0, 32 }
   0x5   :  { %p227_p0 = scmp.ne.s32.totalorder %s364_s0, %s226_s15  ;;  %p230_p1 = scmp.lt.u32.totalorder %s226_s15, %s364_s0 }
   0x7   :  { %p232_p2 = pnand %p230_p1, %p227_p0 }
   0x9   :  { %235 = shalt.err (!%p232_p2)
}
   0xa   :  { %s236_s20 = scalar_lea.vmem %s17_s10, 32  ;;  %p241_p4 = scmp.lt.s32.totalorder %s17_s10, %s17_s10 }
   0xb   :  { %p237_p3 = scmp.ne.s32.totalorder %s17_s10, %s236_s20  ;;  %p242_p5 = scmp.lt.s32.totalorder %s236_s20, %s236_s20 }
   0xd   :  { %p243_p6 = por %p242_p5, %p241_p4 }
   0xf   :  { %p244_p7 = pnand %p243_p6, %p237_p3 }
  0x11   :  { %247 = shalt.err (!%p244_p7)
}
  0x12   :  { %19 = dma.hbm_to_vmem [thread:$0]  %s364_s0, 32, %s17_s10, [#allocation3]  }
  0x13   :  { %s248_s25 = scalar_lea.hbm %s365_s1, 2048 }
  0x14   :  { %p249_p8 = scmp.ne.s32.totalorder %s365_s1, %s248_s25  ;;  %p252_p9 = scmp.lt.u32.totalorder %s248_s25, %s365_s1 }
  0x16   :  { %p254_p10 = pnand %p252_p9, %p249_p8 }
  0x18   :  { %257 = shalt.err (!%p254_p10)
}
  0x19   :  { %s258_s30 = scalar_lea.vmem %s321_s12, 2048  ;;  %p263_p12 = scmp.lt.s32.totalorder %s321_s12, %s321_s12 }
  0x1a   :  { %p259_p11 = scmp.ne.s32.totalorder %s321_s12, %s258_s30  ;;  %p264_p13 = scmp.lt.s32.totalorder %s258_s30, %s258_s30 }
  0x1c   :  { %p265_p0 = por %p264_p13, %p263_p12 }
  0x1e   :  { %p266_p1 = pnand %p265_p0, %p259_p11 }
  0x20   :  { %269 = shalt.err (!%p266_p1)
}
  0x21   :  { %s300_s0 = smov 128   ;;  %s301_s3 = smov 8  }
  0x22   :  { %31 = dma.hbm_to_vmem [thread:$0]  %s365_s1, 2048, %s321_s12, [#allocation6], %s300_s0, %s300_s0, %s301_s3  }
  0x23   :  { %292 = dma.done.wait [#allocation3], 32  }
  0x24   :  { %293 = vsyncadd [#allocation3], 4294967264 }
  0x25   :  { %294 = dma.done.wait [#allocation6], 2048  }
  0x26   :  { %295 = vsyncadd [#allocation6], 4294965248  ;;  %v302_v0 = vmov 0.0|0.0   ;;  %vm303_vm0 = vmmov 0   ;;  %v304_v1 = vmov 0.0   ;;  %v39_v2 = vld [vmem:[#allocation5] sm:$0xff] }
  0x27   :  { %194 = vmatprep.subr.bf16.mxu0 %v302_v0  ;;  %191 = vmatprep.mubr.msk.f32.mxu0 %vm303_vm0, %v304_v1  ;;  %v40_v3 = vld [vmem:[#allocation5 + $0x8] sm:$0xff]  ;;  %v41_v4 = vld [vmem:[#allocation5 + $0x10] sm:$0xff]  ;;  %v42_v6 = vld [vmem:[#allocation5 + $0x18] sm:$0xff]  ;;  %s305_s1 = smov [#allocation7]  }
  0x28   :  { %v195_v5 = vpack.c.bf16 %v40_v3, %v39_v2  ;;  %v198_v7 = vpack.c.bf16 %v42_v6, %v41_v4  ;;  %v43_v8 = vld [vmem:[#allocation5 + $0x20] sm:$0xff]  ;;  %v44_v9 = vld [vmem:[#allocation5 + $0x28] sm:$0xff]  ;;  %v45_v11 = vld [vmem:[#allocation5 + $0x30] sm:$0xff]  ;;  %s132_s6 = sshll.u32 %s305_s1, 4  ;;  %s133_s6 = int_to_ptr.vmem [resolvable:$true] %s132_s6 }
  0x29   :  { %v201_v10 = vpack.c.bf16 %v44_v9, %v43_v8  ;;  %v46_v12 = vld [vmem:[#allocation5 + $0x38] sm:$0xff]  ;;  %v47_v14 = vld [vmem:[#allocation5 + $0x40] sm:$0xff]  ;;  %v48_v15 = vld [vmem:[#allocation5 + $0x48] sm:$0xff]  ;;  %s270_s7 = scalar_lea.vmem %s133_s6, 32  ;;  %p275_p3 = scmp.lt.s32.totalorder %s133_s6, %s133_s6 }
  0x2a   :  { %196 = vmatpush3.bf16.msra.mxu0 %v195_v5  ;;  %v204_v13 = vpack.c.bf16 %v46_v12, %v45_v11  ;;  %v207_v16 = vpack.c.bf16 %v48_v15, %v47_v14  ;;  %v49_v17 = vld [vmem:[#allocation5 + $0x50] sm:$0xff]  ;;  %v50_v18 = vld [vmem:[#allocation5 + $0x58] sm:$0xff]  ;;  %v51_v20 = vld [vmem:[#allocation5 + $0x60] sm:$0xff]  ;;  %p271_p2 = scmp.ne.s32.totalorder %s133_s6, %s270_s7  ;;  %p276_p4 = scmp.lt.s32.totalorder %s270_s7, %s270_s7 }
  0x2b   :  { %197 = vmatprep.subr.bf16.mxu0 %v302_v0  ;;  %v210_v19 = vpack.c.bf16 %v50_v18, %v49_v17  ;;  %v52_v21 = vld [vmem:[#allocation5 + $0x68] sm:$0xff]  ;;  %v53_v23 = vld [vmem:[#allocation5 + $0x70] sm:$0xff]  ;;  %v54_v24 = vld [vmem:[#allocation5 + $0x78] sm:$0xff] }
  0x2c   :  { %v213_v22 = vpack.c.bf16 %v52_v21, %v51_v20  ;;  %v216_v25 = vpack.c.bf16 %v54_v24, %v53_v23  ;;  %v38_v26 = vld [vmem:[#allocation2] sm:$0x3]  ;;  %p277_p5 = por %p276_p4, %p275_p3 }
  0x2e   :  { %199 = vmatpush3.bf16.msra.mxu0 %v198_v7  ;;  %p278_p6 = pnand %p277_p5, %p271_p2 }
  0x2f   :  { %200 = vmatprep.subr.bf16.mxu0 %v302_v0 }
  0x32   :  { %202 = vmatpush3.bf16.msra.mxu0 %v201_v10 }
  0x33   :  { %203 = vmatprep.subr.bf16.mxu0 %v302_v0 }
  0x36   :  { %205 = vmatpush3.bf16.msra.mxu0 %v204_v13 }
  0x37   :  { %206 = vmatprep.subr.bf16.mxu0 %v302_v0 }
  0x3a   :  { %208 = vmatpush3.bf16.msra.mxu0 %v207_v16 }
  0x3b   :  { %209 = vmatprep.subr.bf16.mxu0 %v302_v0 }
  0x3e   :  { %211 = vmatpush3.bf16.msra.mxu0 %v210_v19 }
  0x3f   :  { %212 = vmatprep.subr.bf16.mxu0 %v302_v0 }
  0x42   :  { %214 = vmatpush3.bf16.msra.mxu0 %v213_v22 }
  0x43   :  { %215 = vmatprep.subr.bf16.mxu0 %v302_v0 }
  0x46   :  { %217 = vmatpush3.bf16.msra.mxu0 %v216_v25 }
  0x49   :  { %192 = vmatmul.mubr.f32.vlgmr.msra.gmra.mrb[0].mxu0 %v38_v26 }
 0x11c   :  { %v121_v27 = vpop.f32.mrb[0].mxu0 }
 0x11d   :  { %125 = vst [vmem:[#allocation7] sm:$0x3] %v121_v27  ;;  %v193_v28 = vpop.f32.mrb[1].mxu0 }
 0x11e   :  { %281 = shalt.err (!%p278_p6)
}
 0x11f   :  { %s282_s10 = scalar_lea.hbm %s366_s2, 32 }
 0x120   :  { %p283_p7 = scmp.ne.s32.totalorder %s366_s2, %s282_s10  ;;  %p286_p8 = scmp.lt.u32.totalorder %s282_s10, %s366_s2 }
 0x122   :  { %p288_p9 = pnand %p286_p8, %p283_p7 }
 0x124   :  { %291 = shalt.err (!%p288_p9)
}
 0x125   :  { %135 = dma.vmem_to_hbm [thread:$0]  %s133_s6, 32, %s366_s2, [#allocation4]  }
 0x126   :  { %296 = dma.done.wait [#allocation4], 32  }
 0x127   :  { %297 = vsyncadd [#allocation4], 4294967264 }
 0x128   :  { %139 = vsyncpa [#allocation3], 1 }
 0x129   :  { %140 = vsyncpa [#allocation6], 1 }
 0x12a   :  { %141 = vsyncpa [#allocation4], 1 }

</bundles_post_ra>
